<compile_context>
chip_gen: v6e
topology: v6e:2x2x1
jax: 0.10.0
libtpu: 0.0.40
codegen_flags: <defaults>
</compile_context>

<pallas_src>
import math

import jax
import jax.numpy as jnp
from jax import lax
from jax.experimental import pallas as pl
from jax.experimental.pallas import tpu as pltpu

_LANES = 128
_TILE_ROWS_TARGET = 8192      # 8192 x 128 x 4 B = 4 MiB per f32 input tile
_CHUNK_ROWS = 64              # in-kernel reduction chunk (8 vregs / f32 operand)
_PAD_LOGIT = -1.0e4           # BCEWithLogits(x=-1e4, y=0) == 0 exactly in f32


def _num_tensorcores() -> int:
    """Best-effort TensorCore count per chip (v7x: 2, v5e/v6e: 1)."""
    try:
        info = pltpu.get_tpu_info()
        for attr in ("num_cores", "core_count", "num_tensorcores",
                     "tensorcore_count", "cores_per_chip", "num_tensor_cores"):
            v = getattr(info, attr, None)
            if v is None:
                continue
            try:
                v = int(v)
            except Exception:
                continue
            if 1 <= v <= 8:
                return v
    except Exception:
        pass
    try:
        if "v7" in jax.devices()[0].device_kind.lower():
            return 2
    except Exception:
        pass
    return 1


def _make_bce_kernel(tile_rows: int, tiles_per_shard: int, rows_valid: int,
                     needs_mask: bool):
    """BCE-with-logits partial-sum kernel over a (tile_rows, 128) tile.

    Accumulates per-lane BCE sums and per-lane target max into lane-dense
    (8, 128) resident outputs; lane l carries mask (l % m)."""
    assert tile_rows % 8 == 0
    n_full = tile_rows // _CHUNK_ROWS
    rem = tile_rows % _CHUNK_ROWS          # multiple of 8 by construction

    def kernel(x_ref, y_ref, acc_ref, flag_ref):
        @pl.when(pl.program_id(1) == 0)
        def _():
            acc_ref[...] = jnp.zeros_like(acc_ref)
            flag_ref[...] = jnp.zeros_like(flag_ref)

        if needs_mask:
            # Logical (unclamped) tile index -> first global row of this tile.
            # The input index_map may clamp the DMA to the last in-bounds
            # block; masking on the *logical* row zeroes stale / duplicated
            # data, so no wrapper-side tail padding is needed.
            blk = pl.program_id(0) * tiles_per_shard + pl.program_id(1)
            row0 = blk * tile_rows
            local_rows = lax.broadcasted_iota(jnp.int32, (_CHUNK_ROWS, _LANES), 0)

        def fold(x, y, grow, acc, flg):
            r = x.shape[0]
            assert r % 8 == 0
            xf = x.astype(jnp.float32)
            yf = y.astype(jnp.float32)
            # Numerically stable BCE with logits: max(x,0) - x*y + log1p(exp(-|x|))
            bce = jnp.maximum(xf, 0.0) - xf * yf + jnp.log1p(jnp.exp(-jnp.abs(xf)))
            if grow is not None:
                valid = grow < rows_valid
                bce = jnp.where(valid, bce, 0.0)
                yf = jnp.where(valid, yf, 0.0)
            # (r,128) -> (r//8, 8, 128) is vreg-aligned; the axis-0 reduce is
            # plain vreg adds/maxes (no XLU) into the register-resident partial.
            acc = acc + jnp.sum(bce.reshape(r // 8, 8, _LANES), axis=0)
            flg = jnp.maximum(flg, jnp.max(yf.reshape(r // 8, 8, _LANES), axis=0))
            return acc, flg

        acc0 = jnp.zeros((8, _LANES), jnp.float32)
        flg0 = jnp.zeros((8, _LANES), jnp.float32)

        if n_full > 0:
            def body(k, carry):
                a, f = carry
                r = pl.multiple_of(k * _CHUNK_ROWS, _CHUNK_ROWS)
                x = x_ref[pl.ds(r, _CHUNK_ROWS), :]
                y = y_ref[pl.ds(r, _CHUNK_ROWS), :]
                grow = (row0 + r + local_rows) if needs_mask else None
                return fold(x, y, grow, a, f)

            acc0, flg0 = lax.fori_loop(0, n_full, body, (acc0, flg0))

        if rem:
            r0 = n_full * _CHUNK_ROWS
            x = x_ref[pl.ds(r0, rem), :]
            y = y_ref[pl.ds(r0, rem), :]
            grow = (row0 + r0 + local_rows[:rem]) if needs_mask else None
            acc0, flg0 = fold(x, y, grow, acc0, flg0)

        acc_ref[...] += acc0
        flag_ref[...] = jnp.maximum(flag_ref[...], flg0)

    return kernel


def dice_bce_loss(logits, target, *, tile_rows_target: int = _TILE_ROWS_TARGET):
    """Returns (loss, per_mask_mean[M], active[M]) as device arrays.

    loss = sum over masks m of mean(BCEWithLogits(logits[..., m], target[..., m]))
    restricted to masks whose (binary) target contains a 1.
    Inputs are streamed in their original dtype (bf16/int targets welcome);
    all math is done in f32 inside the kernel.
    """
    assert logits.shape == target.shape
    assert tile_rows_target % 8 == 0

    lg, tg = logits, target
    if lg.ndim == 1:                       # degenerate (M,) input
        lg, tg = lg[None], tg[None]

    orig_m = lg.shape[-1]
    n_per_mask = 1
    for d in lg.shape[:-1]:
        n_per_mask *= d

    # Lane-modulo layout: lane l of the flat (rows, 128) view carries mask
    # (l % m); needs m | 128.  The flat view also needs total % 1024 == 0 so
    # every kernel-side row slice stays (8,128)-aligned.  Both requirements are
    # folded into at most ONE jnp.pad (single extra HBM round trip); the common
    # case (pow-2 mask count, pow-2-ish spatial dims) pads nothing at all.
    m = orig_m
    m_pad = m if _LANES % m == 0 else pl.next_power_of_2(m)
    assert m_pad <= _LANES, "num_masks > 128 not supported"
    # TODO(synk): mask counts > 128 need a multi-lane-group mapping.

    lead = 1
    for d in lg.shape[:-2]:
        lead *= d
    d2 = lg.shape[-2]
    q = (8 * _LANES) // math.gcd(lead * m_pad, 8 * _LANES)
    k2 = (-d2) % q                          # extra rows on dim -2

    if m_pad != m or k2 != 0:
        cfg = [(0, 0)] * (lg.ndim - 2) + [(0, k2), (0, m_pad - m)]
        lg = jnp.pad(lg, cfg, constant_values=_PAD_LOGIT)   # contributes 0 BCE
        tg = jnp.pad(tg, cfg, constant_values=0)             # flag stays 0

    total = lead * (d2 + k2) * m_pad
    rows = total // _LANES                  # multiple of 8 by construction
    lg2 = lg.reshape(rows, _LANES)          # free: data already contiguous
    tg2 = tg.reshape(rows, _LANES)

    tile_rows = tile_rows_target if rows >= tile_rows_target else rows
    n_blocks = -(-rows // tile_rows)
    num_tc = _num_tensorcores()
    n_shards = num_tc if n_blocks >= num_tc else 1
    tiles_per_shard = -(-n_blocks // n_shards)
    needs_mask = n_shards * tiles_per_shard * tile_rows > rows

    if n_shards * tiles_per_shard > n_blocks:
        last = n_blocks - 1
        def in_map(c, i):                   # clamp DMA; duplicates masked in-kernel
            return (jnp.minimum(c * tiles_per_shard + i, last), 0)
    else:
        def in_map(c, i):
            return (c * tiles_per_shard + i, 0)

    n_elems = rows * _LANES
    cost = pl.CostEstimate(
        flops=10 * n_elems,
        transcendentals=2 * n_elems,
        bytes_accessed=(lg2.size * lg2.dtype.itemsize
                        + tg2.size * tg2.dtype.itemsize
                        + 2 * 8 * n_shards * _LANES * 4),
    )

    kernel = _make_bce_kernel(tile_rows, tiles_per_shard, rows, needs_mask)

    acc, flag = pl.pallas_call(
        kernel,
        out_shape=(
            jax.ShapeDtypeStruct((8 * n_shards, _LANES), jnp.float32),
            jax.ShapeDtypeStruct((8 * n_shards, _LANES), jnp.float32),
        ),
        grid=(n_shards, tiles_per_shard),
        in_specs=[
            pl.BlockSpec((tile_rows, _LANES), in_map),
            pl.BlockSpec((tile_rows, _LANES), in_map),
        ],
        out_specs=(
            pl.BlockSpec((8, _LANES), lambda c, i: (c, 0)),
            pl.BlockSpec((8, _LANES), lambda c, i: (c, 0)),
        ),
        compiler_params=pltpu.CompilerParams(
            dimension_semantics=("parallel", "arbitrary"),
            vmem_limit_bytes=32 * 1024 * 1024,
        ),
        cost_estimate=cost,
    )(lg2, tg2)

    # Single cross-lane regroup at the end: lane l of every accumulator row
    # belongs to mask (l % m_pad).
    per_mask_sum = acc.reshape(-1, m_pad).sum(axis=0)
    per_mask_flag = flag.reshape(-1, m_pad).max(axis=0)

    per_mask_mean = per_mask_sum / jnp.float32(n_per_mask)
    active = per_mask_flag >= 1.0           # binary targets: "1 in target[..., m]"
    loss = jnp.sum(jnp.where(active, per_mask_mean, 0.0))
    return loss, per_mask_mean[:orig_m], active[:orig_m]


def dice_bce_loss_with_dict(logits, target):
    """Convenience wrapper matching the PyTorch (loss, {mask_i: float}) return.
    Host-syncs; keep it out of jit-compiled training steps."""
    loss, per_mask_mean, active = dice_bce_loss(logits, target)
    loss = jax.block_until_ready(loss)
    active_h = jax.device_get(active)
    mean_h = jax.device_get(per_mask_mean)
    loss_ret = {f"mask_{i}": float(mean_h[i])
                for i in range(active_h.shape[0]) if bool(active_h[i])}
    return loss, loss_ret


def _reference(logits, target):
    """Pure-JAX reference for sanity-checking the kernel."""
    num_masks = logits.shape[-1]
    total = jnp.float32(0.0)
    for mm in range(num_masks):
        x = logits[..., mm].astype(jnp.float32)
        y = target[..., mm].astype(jnp.float32)
        bce = jnp.mean(jnp.maximum(x, 0.0) - x * y + jnp.log1p(jnp.exp(-jnp.abs(x))))
        total = total + jnp.where(jnp.any(y == 1.0), bce, 0.0)
    return total


if __name__ == "__main__":
    key = jax.random.PRNGKey(0)
    k1, k2, k3, k4, k5, k6 = jax.random.split(key, 6)

    # Test 1: small shape from the module spec; M=4 divides 128, zero padding,
    # single block.  Mask 2 has no positives -> must be excluded from the loss.
    B, H, W, M = 2, 16, 16, 4
    logits = jax.random.normal(k1, (B, H, W, M), dtype=jnp.float32)
    target = (jax.random.uniform(k2, (B, H, W, M)) > 0.5).astype(jnp.float32)
    target = target.at[..., 2].set(0.0)
    loss, loss_ret = dice_bce_loss_with_dict(logits, target)
    ref = jax.block_until_ready(_reference(logits, target))
    assert jnp.allclose(loss, ref, rtol=1e-4, atol=1e-4), (float(loss), float(ref))
    assert "mask_2" not in loss_ret
    assert all(f"mask_{i}" in loss_ret for i in (0, 1, 3))

    # Test 2: mask count 3 does not divide 128 and the element count is not a
    # multiple of 1024 -> exercises the single combined pad + lane regroup.
    logits2 = jax.random.normal(k3, (2, 24, 20, 3), dtype=jnp.float32)
    target2 = (jax.random.uniform(k4, (2, 24, 20, 3)) > 0.5).astype(jnp.float32)
    target2 = target2.at[..., 1].set(0.0)
    loss2, _, active2 = dice_bce_loss(logits2, target2)
    loss2 = jax.block_until_ready(loss2)
    ref2 = jax.block_until_ready(_reference(logits2, target2))
    assert jnp.allclose(loss2, ref2, rtol=1e-4, atol=1e-4), (float(loss2), float(ref2))
    assert bool(active2[0]) and not bool(active2[1]) and bool(active2[2])

    # Test 3: force tiny tiles so the multi-block path (resident accumulator,
    # partial boundary block + in-kernel row masking, shard clamping on 2-TC
    # chips) is exercised without needing a large tensor.
    logits3 = jax.random.normal(k5, (2, 50, 64, 4), dtype=jnp.float32)
    target3 = (jax.random.uniform(k6, (2, 50, 64, 4)) > 0.5).astype(jnp.float32)
    loss3, _, _ = dice_bce_loss(logits3, target3, tile_rows_target=80)
    loss3 = jax.block_until_ready(loss3)
    ref3 = jax.block_until_ready(_reference(logits3, target3))
    assert jnp.allclose(loss3, ref3, rtol=1e-4, atol=1e-4), (float(loss3), float(ref3))

    print("KERNEL_OK")
</pallas_src>

<mosaic_0001>
module attributes {stable_mosaic.version = 11 : i64} {
  func.func @kernel(%arg0: i32, %arg1: i32, %arg2: memref<16x128xf32, #tpu.memory_space<vmem>>, %arg3: memref<16x128xf32, #tpu.memory_space<vmem>>, %arg4: memref<8x128xf32, #tpu.memory_space<vmem>>, %arg5: memref<8x128xf32, #tpu.memory_space<vmem>>) attributes {dimension_semantics = [#tpu.dimension_semantics<parallel>, #tpu.dimension_semantics<arbitrary>], iteration_bounds = array<i64: 1, 1>, scalar_prefetch = 0 : i64, scratch_operands = 0 : i64, tpu.core_type = #tpu.core_type<tc>, window_params = [{transform_indices = @transform_0, window_bounds = array<i64: 16, 128>}, {transform_indices = @transform_1, window_bounds = array<i64: 16, 128>}, {transform_indices = @transform_2, window_bounds = array<i64: 8, 128>}, {transform_indices = @transform_3, window_bounds = array<i64: 8, 128>}]} {
    %c0_i32 = arith.constant 0 : i32
    %0 = arith.cmpi eq, %arg1, %c0_i32 : i32
    %1 = arith.extui %0 : i1 to i32
    %c0_i32_0 = arith.constant 0 : i32
    %2 = arith.cmpi ne, %1, %c0_i32_0 : i32
    scf.if %2 {
      %cst_17 = arith.constant 0.000000e+00 : f32
      %29 = vector.broadcast %cst_17 : f32 to vector<8x128xf32>
      %c0_18 = arith.constant 0 : index
      %c0_19 = arith.constant 0 : index
      %30 = vector.load %arg4[%c0_18, %c0_19] : memref<8x128xf32, #tpu.memory_space<vmem>>, vector<8x128xf32>
      tpu.vector_store %arg4[%c0_18, %c0_19], %29 {strides = array<i32>} : memref<8x128xf32, #tpu.memory_space<vmem>>, vector<8x128xf32>,
      %cst_20 = arith.constant 0.000000e+00 : f32
      %31 = vector.broadcast %cst_20 : f32 to vector<8x128xf32>
      %c0_21 = arith.constant 0 : index
      %c0_22 = arith.constant 0 : index
      %32 = vector.load %arg5[%c0_21, %c0_22] : memref<8x128xf32, #tpu.memory_space<vmem>>, vector<8x128xf32>
      tpu.vector_store %arg5[%c0_21, %c0_22], %31 {strides = array<i32>} : memref<8x128xf32, #tpu.memory_space<vmem>>, vector<8x128xf32>,
    } else {
    }
    %cst = arith.constant 0.000000e+00 : f32
    %3 = vector.broadcast %cst : f32 to vector<8x128xf32>
    %cst_1 = arith.constant 0.000000e+00 : f32
    %4 = vector.broadcast %cst_1 : f32 to vector<8x128xf32>
    %c0 = arith.constant 0 : index
    %c0_2 = arith.constant 0 : index
    %5 = vector.load %arg2[%c0, %c0_2] : memref<16x128xf32, #tpu.memory_space<vmem>>, vector<16x128xf32>
    %c0_3 = arith.constant 0 : index
    %c0_4 = arith.constant 0 : index
    %6 = vector.load %arg3[%c0_3, %c0_4] : memref<16x128xf32, #tpu.memory_space<vmem>>, vector<16x128xf32>
    %cst_5 = arith.constant 0.000000e+00 : f32
    %7 = vector.broadcast %cst_5 : f32 to vector<16x128xf32>
    %8 = arith.maximumf %5, %7 : vector<16x128xf32>
    %9 = arith.mulf %5, %6 : vector<16x128xf32>
    %10 = arith.subf %8, %9 : vector<16x128xf32>
    %11 = math.absf %5 : vector<16x128xf32>
    %cst_6 = arith.constant 0.000000e+00 : f32
    %12 = vector.broadcast %cst_6 : f32 to vector<16x128xf32>
    %13 = arith.subf %12, %11 : vector<16x128xf32>
    %14 = math.exp %13 : vector<16x128xf32>
    %15 = math.log1p %14 : vector<16x128xf32>
    %16 = arith.addf %10, %15 : vector<16x128xf32>
    %17 = vector.shape_cast %16 : vector<16x128xf32> to vector<2x8x128xf32>
    %cst_7 = arith.constant dense<0.000000e+00> : vector<8x128xf32>
    %18 = vector.multi_reduction <add>, %17, %cst_7 [0] : vector<2x8x128xf32> to vector<8x128xf32>
    %19 = arith.addf %3, %18 : vector<8x128xf32>
    %20 = vector.shape_cast %6 : vector<16x128xf32> to vector<2x8x128xf32>
    %cst_8 = arith.constant dense<0xFF800000> : vector<8x128xf32>
    %21 = vector.multi_reduction <maximumf>, %20, %cst_8 [0] : vector<2x8x128xf32> to vector<8x128xf32>
    %22 = arith.maximumf %4, %21 : vector<8x128xf32>
    %c0_9 = arith.constant 0 : index
    %c0_10 = arith.constant 0 : index
    %23 = vector.load %arg4[%c0_9, %c0_10] : memref<8x128xf32, #tpu.memory_space<vmem>>, vector<8x128xf32>
    %24 = arith.addf %23, %19 : vector<8x128xf32>
    %c0_11 = arith.constant 0 : index
    %c0_12 = arith.constant 0 : index
    %25 = vector.load %arg4[%c0_11, %c0_12] : memref<8x128xf32, #tpu.memory_space<vmem>>, vector<8x128xf32>
    tpu.vector_store %arg4[%c0_11, %c0_12], %24 {strides = array<i32>} : memref<8x128xf32, #tpu.memory_space<vmem>>, vector<8x128xf32>,
    %c0_13 = arith.constant 0 : index
    %c0_14 = arith.constant 0 : index
    %26 = vector.load %arg5[%c0_13, %c0_14] : memref<8x128xf32, #tpu.memory_space<vmem>>, vector<8x128xf32>
    %27 = arith.maximumf %26, %22 : vector<8x128xf32>
    %c0_15 = arith.constant 0 : index
    %c0_16 = arith.constant 0 : index
    %28 = vector.load %arg5[%c0_15, %c0_16] : memref<8x128xf32, #tpu.memory_space<vmem>>, vector<8x128xf32>
    tpu.vector_store %arg5[%c0_15, %c0_16], %27 {strides = array<i32>} : memref<8x128xf32, #tpu.memory_space<vmem>>, vector<8x128xf32>,
    return
  }
  func.func @transform_0(%arg0: i32, %arg1: i32) -> (i32, i32) {
    %c1_i32 = arith.constant 1 : i32
    %0 = arith.muli %arg0, %c1_i32 : i32
    %1 = arith.addi %0, %arg1 : i32
    %c0_i32 = arith.constant 0 : i32
    %c0_i32_0 = arith.constant 0 : i32
    return %1, %c0_i32 : i32, i32
  }
  func.func @transform_1(%arg0: i32, %arg1: i32) -> (i32, i32) {
    %c1_i32 = arith.constant 1 : i32
    %0 = arith.muli %arg0, %c1_i32 : i32
    %1 = arith.addi %0, %arg1 : i32
    %c0_i32 = arith.constant 0 : i32
    %c0_i32_0 = arith.constant 0 : i32
    return %1, %c0_i32 : i32, i32
  }
  func.func @transform_2(%arg0: i32, %arg1: i32) -> (i32, i32) {
    %c0_i32 = arith.constant 0 : i32
    %c0_i32_0 = arith.constant 0 : i32
    return %arg0, %c0_i32 : i32, i32
  }
  func.func @transform_3(%arg0: i32, %arg1: i32) -> (i32, i32) {
    %c0_i32 = arith.constant 0 : i32
    %c0_i32_0 = arith.constant 0 : i32
    return %arg0, %c0_i32 : i32, i32
  }
}

</mosaic_0001>

<bundles_post_ra>
// kernel: tpu_custom_call.1
= control target key start
LH: loop header
LB: loop body
LE: loop exit
PB: predicated region body
PF: predicated region fallthrough
CT: control target
= control target key end

     0   :  { %9 = vsyncpa [#allocation3], 0  ;;  %s280_s0 = inlined_call_operand.hbm [shape: f32[16,128], index: 0, kind: input, shape index: {}]   ;;  %s281_s1 = inlined_call_operand.hbm [shape: f32[16,128], index: 1, kind: input, shape index: {}]   ;;  %s282_s2 = inlined_call_operand.hbm [shape: f32[8,128], index: 2, kind: output, shape index: {0}]   ;;  %s283_s3 = inlined_call_operand.hbm [shape: f32[8,128], index: 3, kind: output, shape index: {1}]  }
   0x1   :  { %10 = vsyncpa [#allocation6], 0 }
   0x2   :  { %11 = vsyncpa [#allocation4], 0 }
   0x3   :  { %12 = vsyncpa [#allocation9], 0  ;;  %s242_s12 = smov [#allocation2]  }
   0x4   :  { %s22_s13 = sshll.u32 %s242_s12, 4  ;;  %s23_s13 = int_to_ptr.vmem [resolvable:$true] %s22_s13 }
   0x5   :  { %s162_s14 = scalar_lea.vmem %s23_s13, 256  ;;  %p167_p1 = scmp.lt.s32.totalorder %s23_s13, %s23_s13 }
   0x6   :  { %p163_p0 = scmp.ne.s32.totalorder %s23_s13, %s162_s14  ;;  %p168_p2 = scmp.lt.s32.totalorder %s162_s14, %s162_s14 }
   0x8   :  { %p169_p3 = por %p168_p2, %p167_p1 }
   0xa   :  { %p170_p4 = pnand %p169_p3, %p163_p0 }
   0xc   :  { %173 = shalt.err (!%p170_p4)
}
   0xd   :  { %s243_s15 = smov 128   ;;  %s244_s16 = smov 8  }
   0xe   :  { %28 = dma.hbm_to_vmem [thread:$0]  %s280_s0, 256, %s23_s13, [#allocation3], %s243_s15, %s243_s15, %s244_s16  }
   0xf   :  { %s245_s19 = smov [#allocation5]  }
  0x10   :  { %s38_s20 = sshll.u32 %s245_s19, 4  ;;  %s39_s20 = int_to_ptr.vmem [resolvable:$true] %s38_s20 }
  0x11   :  { %s182_s21 = scalar_lea.vmem %s39_s20, 256  ;;  %p187_p6 = scmp.lt.s32.totalorder %s39_s20, %s39_s20 }
  0x12   :  { %p183_p5 = scmp.ne.s32.totalorder %s39_s20, %s182_s21  ;;  %p188_p7 = scmp.lt.s32.totalorder %s182_s21, %s182_s21 }
  0x14   :  { %p189_p8 = por %p188_p7, %p187_p6 }
  0x16   :  { %p190_p9 = pnand %p189_p8, %p183_p5 }
  0x18   :  { %193 = shalt.err (!%p190_p9)
}
  0x19   :  { %44 = dma.hbm_to_vmem [thread:$0]  %s281_s1, 256, %s39_s20, [#allocation6], %s243_s15, %s243_s15, %s244_s16  }
  0x1a   :  { %234 = dma.done.wait [#allocation3], 256  }
  0x1b   :  { %235 = vsyncadd [#allocation3], 4294967040 }
  0x1c   :  { %236 = dma.done.wait [#allocation6], 256  }
  0x1d   :  { %237 = vsyncadd [#allocation6], 4294967040  ;;  %v61_v0 = vld [vmem:[#allocation2] sm:$0xff]  ;;  %v62_v1 = vld [vmem:[#allocation2 + $0x8] sm:$0xff]  ;;  %s246_s0 = smov [#allocation8]  }
  0x1e   :  { %v63_v2 = vld [vmem:[#allocation5] sm:$0xff]  ;;  %v64_v3 = vld [vmem:[#allocation5 + $0x8] sm:$0xff]  ;;  %v71_v4 = vand.u32 2147483647, %v61_v0  ;;  %v72_v5 = vand.u32 2147483647, %v62_v1 }
  0x1f   :  { %v101_v6 = vmax.f32 %v63_v2, %v64_v3  ;;  %s125_s24 = sshll.u32 %s246_s0, 4  ;;  %s126_s24 = int_to_ptr.vmem [resolvable:$true] %s125_s24 }
  0x20   :  { %v73_v7 = vsub.f32 0.0, %v71_v4  ;;  %v74_v8 = vsub.f32 0.0, %v72_v5  ;;  %s194_s1 = scalar_lea.vmem %s126_s24, 128  ;;  %p199_p11 = scmp.lt.s32.totalorder %s126_s24, %s126_s24 }
  0x21   :  { %v102_v9 = vmax.f32 %v101_v6, 0.0  ;;  %p195_p10 = scmp.ne.s32.totalorder %s126_s24, %s194_s1  ;;  %p200_p12 = scmp.lt.s32.totalorder %s194_s1, %s194_s1 }
  0x22   :  { %v75_v10 = vmul.f32 1.442695, %v73_v7  ;;  %v77_v11 = vmul.f32 1.442695, %v74_v8 }
  0x23   :  { %v107_v12 = vmax.f32 %v102_v9, 0.0  ;;  %p201_p13 = por %p200_p12, %p199_p11 }
  0x24   :  { %146 = vpow2.f32 %v75_v10 }
  0x25   :  { %148 = vpow2.f32 %v77_v11  ;;  %108 = vst [vmem:[#allocation8] sm:$0xff] %v107_v12  ;;  %p202_p0 = pnand %p201_p13, %p195_p10 }
  0x27   :  { %205 = shalt.err (!%p202_p0)
}
  0x28   :  { %128 = dma.vmem_to_hbm [thread:$0]  %s126_s24, 128, %s283_s3, [#allocation9]   ;;  %v65_v20 = vmax.f32 %v61_v0, 0.0  ;;  %v67_v21 = vmul.f32 %v63_v2, %v61_v0  ;;  %v66_v24 = vmax.f32 %v62_v1, 0.0  ;;  %v68_v25 = vmul.f32 %v64_v3, %v62_v1 }
  0x29   :  { %s247_s3 = smov [#allocation7]  }
  0x2a   :  { %v69_v29 = vsub.f32 %v65_v20, %v67_v21  ;;  %v70_v32 = vsub.f32 %v66_v24, %v68_v25  ;;  %s115_s27 = sshll.u32 %s247_s3, 4  ;;  %s116_s27 = int_to_ptr.vmem [resolvable:$true] %s115_s27 }
  0x2b   :  { %s214_s28 = scalar_lea.vmem %s116_s27, 128  ;;  %p219_p2 = scmp.lt.s32.totalorder %s116_s27, %s116_s27 }
  0x2c   :  { %p215_p1 = scmp.ne.s32.totalorder %s116_s27, %s214_s28  ;;  %p220_p3 = scmp.lt.s32.totalorder %s214_s28, %s214_s28 }
  0x2e   :  { %p221_p4 = por %p220_p3, %p219_p2 }
  0x30   :  { %p222_p5 = pnand %p221_p4, %p215_p1 }
  0x31   :  { %v147_v13 = vpop.eup %146 }
  0x32   :  { %v149_v14 = vpop.eup %148  ;;  %v79_v15 = vadd.f32 1.0, %v147_v13  ;;  %v82_v17 = vmul.f32 -0.5, %v147_v13  ;;  %v85_v22 = vand.u32 2147483647, %v147_v13 }
  0x33   :  { %v88_v16 = vadd.f32 1.0, %v149_v14  ;;  %v91_v18 = vmul.f32 -0.5, %v149_v14  ;;  %v94_v26 = vand.u32 2147483647, %v149_v14 }
  0x34   :  { %150 = vlog2.f32 %v79_v15  ;;  %v83_v19 = vadd.f32 1.0, %v82_v17  ;;  %vm86_vm0 = vcmp.lt.f32.partialorder %v85_v22, 0.0004427343 }
  0x35   :  { %152 = vlog2.f32 %v88_v16  ;;  %v92_v23 = vadd.f32 1.0, %v91_v18  ;;  %vm95_vm1 = vcmp.lt.f32.partialorder %v94_v26, 0.0004427343 }
  0x36   :  { %v84_v27 = vmul.f32 %v147_v13, %v83_v19 }
  0x37   :  { %v93_v30 = vmul.f32 %v149_v14, %v92_v23 }
  0x41   :  { %v151_v28 = vpop.eup %150 }
  0x42   :  { %v153_v31 = vpop.eup %152  ;;  %v81_v33 = vmul.f32 0.6931472, %v151_v28 }
  0x43   :  { %v90_v34 = vmul.f32 0.6931472, %v153_v31 }
  0x44   :  { %v87_v35 = vsel %vm86_vm0, %v84_v27, %v81_v33 }
  0x45   :  { %v96_v36 = vsel %vm95_vm1, %v93_v30, %v90_v34  ;;  %v97_v37 = vadd.f32 %v87_v35, %v69_v29 }
  0x46   :  { %v98_v38 = vadd.f32 %v96_v36, %v70_v32 }
  0x48   :  { %v99_v39 = vadd.f32 %v98_v38, %v97_v37 }
  0x4a   :  { %105 = vst [vmem:[#allocation7] sm:$0xff] %v99_v39 }
  0x4b   :  { %225 = shalt.err (!%p222_p5)
}
  0x4c   :  { %118 = dma.vmem_to_hbm [thread:$0]  %s116_s27, 128, %s282_s2, [#allocation4]  }
  0x4d   :  { %238 = dma.done.wait [#allocation4], 128  }
  0x4e   :  { %239 = vsyncadd [#allocation4], 4294967168 }
  0x4f   :  { %240 = dma.done.wait [#allocation9], 128  }
  0x50   :  { %241 = vsyncadd [#allocation9], 4294967168 }
  0x51   :  { %135 = vsyncpa [#allocation3], 1 }
  0x52   :  { %136 = vsyncpa [#allocation6], 1 }
  0x53   :  { %137 = vsyncpa [#allocation4], 1 }
  0x54   :  { %138 = vsyncpa [#allocation9], 1 }

</bundles_post_ra>
